<compile_context>
chip_gen: v6e
topology: v6e:2x2x1
jax: 0.10.0
libtpu: 0.0.40
codegen_flags: <defaults>
</compile_context>

<pallas_src>
import math

import jax
import jax.numpy as jnp
import numpy as np
from jax.experimental import pallas as pl
from jax.experimental.pallas import tpu as pltpu


# ---------------------------------------------------------------------------
# Budgets / tiling helpers
# ---------------------------------------------------------------------------
def _round_up(x, m):
    return ((x + m - 1) // m) * m


def _cdiv(a, b):
    return -(-a // b)


def _vmem_limit_bytes():
    # ~5/8 of physical VMEM, capped: v5e/v6e (128 MiB) -> 80 MB, v7x (64 MiB) -> 40 MB.
    cap = 64 * 1024 * 1024
    try:
        info = pltpu.get_tpu_info()
        cap = int(getattr(info, "vmem_capacity_bytes", cap))
    except Exception:
        pass
    return min(cap * 5 // 8, 100 * 1024 * 1024)


_VMEM_LIMIT = _vmem_limit_bytes()
_M_CAP = 256          # whole batch = one M block up to this many rows
_K_CAP = 2048         # single full-depth K tile up to this contraction depth

_COMPILER_PARAMS = pltpu.CompilerParams(
    dimension_semantics=("parallel", "parallel", "arbitrary"),
    vmem_limit_bytes=_VMEM_LIMIT,
)


def _split_even(dim, unit, max_units):
    """Tile `dim` in multiples of `unit`: as few, evenly-sized tiles as possible,
    each <= unit*max_units.  Returns (padded_dim, tile)."""
    units = max(1, _cdiv(dim, unit))
    n_tiles = _cdiv(units, max_units)
    per_tile = _cdiv(units, n_tiles)
    tile = unit * per_tile
    return n_tiles * tile, tile


def _pick_n(out_features):
    """Lane-dense output tiling; force >=2 N tiles when there are >=4 lane groups
    so both v7x TensorCores get disjoint weight columns (no weight duplication)."""
    units = max(1, _cdiv(out_features, 128))
    n_tiles = _cdiv(units, 4)                    # tn <= 512
    if units >= 4:
        n_tiles = max(n_tiles, 2)
    per_tile = _cdiv(units, n_tiles)
    tn = 128 * per_tile
    return n_tiles * tn, tn


def _pick_k(k, k_cap):
    """Single full-depth tile (no padding at all) when it fits, else even
    128-multiple tiles."""
    if k <= k_cap:
        return k, k
    return _split_even(k, 128, max(1, k_cap // 128))


# ---------------------------------------------------------------------------
# Kernels (single-K specializations have no accumulator scratch)
# ---------------------------------------------------------------------------
def _weak_single(f_ref, c_ref, wf_ref, wc_ref, b_ref, o_ref):
    acc = jnp.dot(f_ref[...], wf_ref[...], preferred_element_type=jnp.float32)
    acc = acc + jnp.dot(c_ref[...], wc_ref[...], preferred_element_type=jnp.float32)
    o_ref[...] = (acc + b_ref[...]).astype(o_ref.dtype)


def _weak_multi(f_ref, c_ref, wf_ref, wc_ref, b_ref, o_ref, acc_ref):
    k = pl.program_id(2)

    @pl.when(k == 0)
    def _():
        acc_ref[...] = jnp.zeros_like(acc_ref)

    acc_ref[...] += jnp.dot(f_ref[...], wf_ref[...], preferred_element_type=jnp.float32)

    @pl.when(k == pl.num_programs(2) - 1)
    def _():
        acc = acc_ref[...] + jnp.dot(c_ref[...], wc_ref[...],
                                     preferred_element_type=jnp.float32)
        o_ref[...] = (acc + b_ref[...]).astype(o_ref.dtype)


def _strong_single(f_ref, c_ref, w_ref, e_ref, b_ref, o_ref):
    acc = jnp.dot(f_ref[...], w_ref[...], preferred_element_type=jnp.float32)
    gate = jnp.dot(c_ref[...], e_ref[...], preferred_element_type=jnp.float32)
    o_ref[...] = ((acc + b_ref[...]) * gate).astype(o_ref.dtype)


def _strong_multi(f_ref, c_ref, w_ref, e_ref, b_ref, o_ref, acc_ref):
    k = pl.program_id(2)

    @pl.when(k == 0)
    def _():
        acc_ref[...] = jnp.zeros_like(acc_ref)

    acc_ref[...] += jnp.dot(f_ref[...], w_ref[...], preferred_element_type=jnp.float32)

    @pl.when(k == pl.num_programs(2) - 1)
    def _():
        gate = jnp.dot(c_ref[...], e_ref[...], preferred_element_type=jnp.float32)
        o_ref[...] = ((acc_ref[...] + b_ref[...]) * gate).astype(o_ref.dtype)


def _pure_slab(f, cond, n_cond):
    # slab[:, c*tk + i] = cond[:, c] * f[:, i]  — the bilinear activation built
    # in VMEM (never materialized in HBM).  tk is a multiple of 128 so the
    # lane-axis concat is block-aligned.
    return jnp.concatenate([cond[:, c:c + 1] * f for c in range(n_cond)], axis=-1)


def _pure_single(f_ref, c_ref, w_ref, b_ref, o_ref):
    n_cond, tk, tn = w_ref.shape
    slab = _pure_slab(f_ref[...], c_ref[...], n_cond)
    w_flat = w_ref[...].reshape(n_cond * tk, tn)      # leading-dim merge, layout-clean
    acc = jnp.dot(slab, w_flat, preferred_element_type=jnp.float32)
    o_ref[...] = (acc + b_ref[...]).astype(o_ref.dtype)


def _pure_multi(f_ref, c_ref, w_ref, b_ref, o_ref, acc_ref):
    k = pl.program_id(2)

    @pl.when(k == 0)
    def _():
        acc_ref[...] = jnp.zeros_like(acc_ref)

    n_cond, tk, tn = w_ref.shape
    slab = _pure_slab(f_ref[...], c_ref[...], n_cond)
    w_flat = w_ref[...].reshape(n_cond * tk, tn)
    acc_ref[...] += jnp.dot(slab, w_flat, preferred_element_type=jnp.float32)

    @pl.when(k == pl.num_programs(2) - 1)
    def _():
        o_ref[...] = (acc_ref[...] + b_ref[...]).astype(o_ref.dtype)


# ---------------------------------------------------------------------------
# Params: torch-layout init + one-time kernel-layout preparation
# ---------------------------------------------------------------------------
def init_params(key, in_features, out_features, cond_features, method):
    k0, k1, k2 = jax.random.split(key, 3)
    s = 0.05
    if method == 'weak':
        return {'w': s * jax.random.normal(k0, (out_features, in_features + cond_features), jnp.float32),
                'b': s * jax.random.normal(k1, (out_features,), jnp.float32)}
    if method == 'strong':
        return {'w': s * jax.random.normal(k0, (out_features, in_features), jnp.float32),
                'b': s * jax.random.normal(k1, (out_features,), jnp.float32),
                'e': s * jax.random.normal(k2, (out_features, cond_features), jnp.float32)}
    if method == 'pure':
        return {'w': s * jax.random.normal(k0, (out_features, in_features, cond_features), jnp.float32),
                'b': s * jax.random.normal(k1, (out_features,), jnp.float32)}
    raise ValueError("Unknown method, should be 'weak', 'strong', or 'pure'.")


def prepare_kernel_params(params, in_features, out_features, cond_features, method,
                          *, param_dtype=jnp.float32, k_cap=_K_CAP):
    """One-time pre-transpose + lane/sublane zero-pad of weights to kernel layout.
    For bf16 activations pass param_dtype=jnp.bfloat16 (halves weight HBM traffic
    and VMEM; accumulation stays f32)."""
    I, C, O = in_features, cond_features, out_features
    Np, tn = _pick_n(O)
    b = jnp.zeros((1, Np), jnp.float32).at[0, :O].set(params['b'].astype(jnp.float32))
    meta = dict(method=method, I=I, C=C, O=O, Np=Np, tn=tn, b=b)
    itemsize = jnp.dtype(param_dtype).itemsize

    if method == 'weak':
        Kp, tk = _pick_k(I, k_cap)
        Cp = _round_up(C, 128)
        wf = jnp.zeros((Kp, Np), param_dtype).at[:I, :O].set(
            params['w'][:, :I].T.astype(param_dtype))
        wc = jnp.zeros((Cp, Np), param_dtype).at[:C, :O].set(
            params['w'][:, I:].T.astype(param_dtype))
        meta.update(Kp=Kp, tk=tk, Cp=Cp, wf_t=wf, wc_t=wc)
    elif method == 'strong':
        Kp, tk = _pick_k(I, k_cap)
        Cp = _round_up(C, 128)
        w_t = jnp.zeros((Kp, Np), param_dtype).at[:I, :O].set(params['w'].T.astype(param_dtype))
        e_t = jnp.zeros((Cp, Np), param_dtype).at[:C, :O].set(params['e'].T.astype(param_dtype))
        meta.update(Kp=Kp, tk=tk, Cp=Cp, w_t=w_t, e_t=e_t)
    elif method == 'pure':
        Ip0 = _round_up(I, 128)
        # Budget the (C, tk, tn) weight block (double-buffered) plus the in-kernel
        # (tm, C*tk) scaled slab against scoped VMEM (v7x automatically tighter).
        budget = _VMEM_LIMIT // 4
        per_unit = C * 128 * (2 * tn * itemsize + _M_CAP * 4)
        k_units = max(1, budget // max(per_unit, 1))
        Kp, tk = _pick_k(Ip0, max(128, min(k_cap, 128 * k_units)))
        # TODO(synk): if C*tn is so large that even tk=128 busts the VMEM budget,
        # tile cond_features as an extra 'arbitrary' grid/contraction axis.
        w_p = jnp.zeros((C, Kp, Np), param_dtype).at[:, :I, :O].set(
            jnp.transpose(params['w'], (2, 1, 0)).astype(param_dtype))
        meta.update(Kp=Kp, tk=tk, w_p=w_p)
    else:
        raise ValueError("Unknown method, should be 'weak', 'strong', or 'pure'.")
    return meta


# ---------------------------------------------------------------------------
# Forward
# ---------------------------------------------------------------------------
def conditional_linear(kp, f_in, cond_vec):
    method = kp['method']
    B = f_in.shape[0]
    I, C, O = kp['I'], kp['C'], kp['O']
    Np, tn, Kp, tk = kp['Np'], kp['tn'], kp['Kp'], kp['tk']
    dtype = f_in.dtype
    cond_vec = cond_vec.astype(dtype)   # explicit: avoid silent mixed-dtype math

    # M: whole batch = one block when it fits -> weights streamed from HBM once.
    if B <= _M_CAP:
        Mp = _round_up(B, 8)
        tm = Mp
    else:
        Mp, tm = _split_even(B, 8, _M_CAP // 8)

    nk = Kp // tk
    grid = (Mp // tm, Np // tn, nk)

    def pad2(x, rows, cols):
        r, c = x.shape
        if (r, c) == (rows, cols):
            return x
        return jnp.zeros((rows, cols), dtype).at[:r, :c].set(x)

    f_p = pad2(f_in, Mp, Kp)

    def call(kernel, in_specs, inputs, flops, bytes_accessed, needs_acc):
        out = pl.pallas_call(
            kernel,
            grid_spec=pltpu.PrefetchScalarGridSpec(
                num_scalar_prefetch=0,
                grid=grid,
                in_specs=in_specs,
                out_specs=pl.BlockSpec((tm, tn), lambda i, j, k: (i, j)),
                scratch_shapes=([pltpu.VMEM((tm, tn), jnp.float32)] if needs_acc else []),
            ),
            out_shape=jax.ShapeDtypeStruct((Mp, Np), dtype),
            compiler_params=_COMPILER_PARAMS,
            cost_estimate=pl.CostEstimate(flops=int(flops), transcendentals=0,
                                          bytes_accessed=int(bytes_accessed)),
        )(*inputs)
        return out[:B, :O]

    if method in ('weak', 'strong'):
        Cp = kp['Cp']
        c_p = pad2(cond_vec, Mp, Cp)
        in_specs = [
            pl.BlockSpec((tm, tk), lambda i, j, k: (i, k)),   # f
            pl.BlockSpec((tm, Cp), lambda i, j, k: (i, 0)),   # cond (fetched once)
            pl.BlockSpec((tk, tn), lambda i, j, k: (k, j)),   # main weight
            pl.BlockSpec((Cp, tn), lambda i, j, k: (0, j)),   # cond weight / gate weight
            pl.BlockSpec((1, tn), lambda i, j, k: (0, j)),    # bias
        ]
        if method == 'weak':
            kernel = _weak_single if nk == 1 else _weak_multi
            inputs = [f_p, c_p, kp['wf_t'], kp['wc_t'], kp['b']]
        else:
            kernel = _strong_single if nk == 1 else _strong_multi
            inputs = [f_p, c_p, kp['w_t'], kp['e_t'], kp['b']]
        flops = 2 * Mp * Np * (Kp + Cp)
        nbytes = 4 * (Mp * Kp + Mp * Cp + (Kp + Cp) * Np + Mp * Np)
        return call(kernel, in_specs, inputs, flops, nbytes, nk > 1)

    if method == 'pure':
        c_p = pad2(cond_vec, Mp, C)
        in_specs = [
            pl.BlockSpec((tm, tk), lambda i, j, k: (i, k)),      # f
            pl.BlockSpec((tm, C), lambda i, j, k: (i, 0)),       # cond (raw lanes)
            pl.BlockSpec((C, tk, tn), lambda i, j, k: (0, k, j)),  # bilinear weight
            pl.BlockSpec((1, tn), lambda i, j, k: (0, j)),       # bias
        ]
        kernel = _pure_single if nk == 1 else _pure_multi
        flops = 2 * Mp * Np * Kp * C
        nbytes = 4 * (Mp * Kp + Mp * C + C * Kp * Np + Mp * Np)
        return call(kernel, in_specs, [f_p, c_p, kp['w_p'], kp['b']], flops, nbytes, nk > 1)

    raise ValueError("Unknown method, should be 'weak', 'strong', or 'pure'.")


# ---------------------------------------------------------------------------
# Pure-JAX reference (mirrors the PyTorch forward exactly)
# ---------------------------------------------------------------------------
def ref_forward(params, f_in, cond_vec, method):
    with jax.default_matmul_precision('highest'):
        if method == 'weak':
            x = jnp.concatenate([f_in, cond_vec], axis=-1)
            return x @ params['w'].T + params['b']
        if method == 'strong':
            return (f_in @ params['w'].T + params['b']) * (cond_vec @ params['e'].T)
        if method == 'pure':
            return jnp.einsum('bi,oij,bj->bo', f_in, params['w'], cond_vec) + params['b']
    raise ValueError(method)


if __name__ == "__main__":
    key = jax.random.PRNGKey(0)
    k_f, k_c, k_p = jax.random.split(key, 3)

    # (B, I, C, O, k_cap): k_cap=128 on config 2 forces the multi-K accumulator
    # path at small shapes; config 3 exercises 2 N tiles + M/K padding.
    configs = [
        (8, 32, 8, 32, None),
        (24, 320, 8, 200, 128),
        (20, 64, 4, 512, None),
    ]
    for ci, (B, I, C, O, k_cap) in enumerate(configs):
        f_in = jax.random.normal(jax.random.fold_in(k_f, ci), (B, I), jnp.float32)
        cond_vec = jax.random.normal(jax.random.fold_in(k_c, ci), (B, C), jnp.float32)
        for mi, method in enumerate(('weak', 'strong', 'pure')):
            params = init_params(jax.random.fold_in(k_p, 10 * ci + mi), I, O, C, method)
            kw = {} if k_cap is None else dict(k_cap=k_cap)
            kparams = prepare_kernel_params(params, I, O, C, method, **kw)
            out = jax.block_until_ready(conditional_linear(kparams, f_in, cond_vec))
            ref = ref_forward(params, f_in, cond_vec, method)
            assert out.shape == (B, O)
            np.testing.assert_allclose(np.asarray(out), np.asarray(ref),
                                       rtol=1e-4, atol=1e-4)

    print("KERNEL_OK")
</pallas_src>

<mosaic_0001>
module attributes {stable_mosaic.version = 11 : i64} {
  func.func @_weak_single(%arg0: i32, %arg1: i32, %arg2: i32, %arg3: memref<8x32xf32, #tpu.memory_space<vmem>>, %arg4: memref<8x128xf32, #tpu.memory_space<vmem>>, %arg5: memref<32x128xf32, #tpu.memory_space<vmem>>, %arg6: memref<128x128xf32, #tpu.memory_space<vmem>>, %arg7: memref<1x128xf32, #tpu.memory_space<vmem>>, %arg8: memref<8x128xf32, #tpu.memory_space<vmem>>) attributes {dimension_semantics = [#tpu.dimension_semantics<parallel>, #tpu.dimension_semantics<parallel>, #tpu.dimension_semantics<arbitrary>], iteration_bounds = array<i64: 1, 1, 1>, scalar_prefetch = 0 : i64, scratch_operands = 0 : i64, tpu.core_type = #tpu.core_type<tc>, window_params = [{transform_indices = @transform_0, window_bounds = array<i64: 8, 32>}, {transform_indices = @transform_1, window_bounds = array<i64: 8, 128>}, {transform_indices = @transform_2, window_bounds = array<i64: 32, 128>}, {transform_indices = @transform_3, window_bounds = array<i64: 128, 128>}, {transform_indices = @transform_4, window_bounds = array<i64: 1, 128>}, {transform_indices = @transform_5, window_bounds = array<i64: 8, 128>}]} {
    %c0 = arith.constant 0 : index
    %c0_0 = arith.constant 0 : index
    %0 = vector.load %arg3[%c0, %c0_0] : memref<8x32xf32, #tpu.memory_space<vmem>>, vector<8x32xf32>
    %c0_1 = arith.constant 0 : index
    %c0_2 = arith.constant 0 : index
    %1 = vector.load %arg5[%c0_1, %c0_2] : memref<32x128xf32, #tpu.memory_space<vmem>>, vector<32x128xf32>
    %cst = arith.constant dense<0.000000e+00> : vector<8x128xf32>
    %2 = tpu.matmul %0, %1, %cst {dimension_numbers = #tpu.dot_dimension_numbers<[1], [0], [0], [1], [0, 0, 1, 1], [], []>} : vector<8x32xf32>, vector<32x128xf32>, vector<8x128xf32> -> vector<8x128xf32>
    %c0_3 = arith.constant 0 : index
    %c0_4 = arith.constant 0 : index
    %3 = vector.load %arg4[%c0_3, %c0_4] : memref<8x128xf32, #tpu.memory_space<vmem>>, vector<8x128xf32>
    %c0_5 = arith.constant 0 : index
    %c0_6 = arith.constant 0 : index
    %4 = vector.load %arg6[%c0_5, %c0_6] : memref<128x128xf32, #tpu.memory_space<vmem>>, vector<128x128xf32>
    %cst_7 = arith.constant dense<0.000000e+00> : vector<8x128xf32>
    %5 = tpu.matmul %3, %4, %cst_7 {dimension_numbers = #tpu.dot_dimension_numbers<[1], [0], [0], [1], [0, 0, 1, 1], [], []>} : vector<8x128xf32>, vector<128x128xf32>, vector<8x128xf32> -> vector<8x128xf32>
    %6 = arith.addf %2, %5 : vector<8x128xf32>
    %c0_8 = arith.constant 0 : index
    %c0_9 = arith.constant 0 : index
    %7 = vector.load %arg7[%c0_8, %c0_9] : memref<1x128xf32, #tpu.memory_space<vmem>>, vector<1x128xf32>
    %8 = vector.broadcast %7 : vector<1x128xf32> to vector<8x128xf32>
    %9 = arith.addf %6, %8 : vector<8x128xf32>
    %c0_10 = arith.constant 0 : index
    %c0_11 = arith.constant 0 : index
    %10 = vector.load %arg8[%c0_10, %c0_11] : memref<8x128xf32, #tpu.memory_space<vmem>>, vector<8x128xf32>
    tpu.vector_store %arg8[%c0_10, %c0_11], %9 {strides = array<i32>} : memref<8x128xf32, #tpu.memory_space<vmem>>, vector<8x128xf32>,
    return
  }
  func.func @transform_0(%arg0: i32, %arg1: i32, %arg2: i32) -> (i32, i32) {
    %c0_i32 = arith.constant 0 : i32
    return %arg0, %arg2 : i32, i32
  }
  func.func @transform_1(%arg0: i32, %arg1: i32, %arg2: i32) -> (i32, i32) {
    %c0_i32 = arith.constant 0 : i32
    %c0_i32_0 = arith.constant 0 : i32
    return %arg0, %c0_i32 : i32, i32
  }
  func.func @transform_2(%arg0: i32, %arg1: i32, %arg2: i32) -> (i32, i32) {
    %c0_i32 = arith.constant 0 : i32
    return %arg2, %arg1 : i32, i32
  }
  func.func @transform_3(%arg0: i32, %arg1: i32, %arg2: i32) -> (i32, i32) {
    %c0_i32 = arith.constant 0 : i32
    %c0_i32_0 = arith.constant 0 : i32
    return %c0_i32, %arg1 : i32, i32
  }
  func.func @transform_4(%arg0: i32, %arg1: i32, %arg2: i32) -> (i32, i32) {
    %c0_i32 = arith.constant 0 : i32
    %c0_i32_0 = arith.constant 0 : i32
    return %c0_i32, %arg1 : i32, i32
  }
  func.func @transform_5(%arg0: i32, %arg1: i32, %arg2: i32) -> (i32, i32) {
    %c0_i32 = arith.constant 0 : i32
    return %arg0, %arg1 : i32, i32
  }
}

</mosaic_0001>

<bundles_post_ra>
// kernel: tpu_custom_call.1
= control target key start
LH: loop header
LB: loop body
LE: loop exit
PB: predicated region body
PF: predicated region fallthrough
CT: control target
= control target key end

     0   :  { %10 = vsyncpa [#allocation3], 0  ;;  %s530_s0 = inlined_call_operand.hbm [shape: f32[8,32], index: 0, kind: input, shape index: {}]   ;;  %s531_s1 = inlined_call_operand.hbm [shape: f32[8,128], index: 1, kind: input, shape index: {}]   ;;  %s532_s2 = inlined_call_operand.hbm [shape: f32[32,128], index: 2, kind: input, shape index: {}]   ;;  %s533_s3 = inlined_call_operand.hbm [shape: f32[128,128], index: 3, kind: input, shape index: {}]   ;;  %s534_s4 = inlined_call_operand.vmem [shape: f32[1,128], index: 4, kind: input, shape index: {}]   ;;  %s535_s5 = inlined_call_operand.hbm [shape: f32[8,128], index: 5, kind: output, shape index: {}]  }
   0x1   :  { %11 = vsyncpa [#allocation6], 0 }
   0x2   :  { %12 = vsyncpa [#allocation9], 0 }
   0x3   :  { %13 = vsyncpa [#allocation4], 0  ;;  %s451_s18 = smov [#allocation5]   ;;  %s452_s20 = smov [#allocation2]  }
   0x4   :  { %s30_s19 = sshll.u32 %s451_s18, 4  ;;  %s20_s21 = sshll.u32 %s452_s20, 4  ;;  %s31_s19 = int_to_ptr.vmem [resolvable:$true] %s30_s19  ;;  %s21_s21 = int_to_ptr.vmem [resolvable:$true] %s20_s21 }
   0x5   :  { %s351_s22 = scalar_lea.vmem %s31_s19, 128  ;;  %p356_p1 = scmp.lt.s32.totalorder %s31_s19, %s31_s19 }
   0x6   :  { %p352_p0 = scmp.ne.s32.totalorder %s31_s19, %s351_s22  ;;  %p357_p2 = scmp.lt.s32.totalorder %s351_s22, %s351_s22 }
   0x8   :  { %p358_p3 = por %p357_p2, %p356_p1 }
   0xa   :  { %p359_p4 = pnand %p358_p3, %p352_p0 }
   0xc   :  { %362 = shalt.err (!%p359_p4)
}
   0xd   :  { %33 = dma.hbm_to_vmem [thread:$0]  %s531_s1, 128, %s31_s19, [#allocation6]  }
   0xe   :  { %s371_s25 = scalar_lea.vmem %s21_s21, 128  ;;  %p376_p6 = scmp.lt.s32.totalorder %s21_s21, %s21_s21 }
   0xf   :  { %p372_p5 = scmp.ne.s32.totalorder %s21_s21, %s371_s25  ;;  %p377_p7 = scmp.lt.s32.totalorder %s371_s25, %s371_s25 }
  0x11   :  { %p378_p8 = por %p377_p7, %p376_p6 }
  0x13   :  { %p379_p9 = pnand %p378_p8, %p372_p5 }
  0x15   :  { %382 = shalt.err (!%p379_p9)
}
  0x16   :  { %23 = dma.hbm_to_vmem [thread:$0]  %s530_s0, 128, %s21_s21, [#allocation3]  }
  0x17   :  { %s453_s28 = smov [#allocation7]  }
  0x18   :  { %s39_s29 = sshll.u32 %s453_s28, 4  ;;  %s40_s29 = int_to_ptr.vmem [resolvable:$true] %s39_s29 }
  0x19   :  { %s391_s30 = scalar_lea.vmem %s40_s29, 512  ;;  %p396_p11 = scmp.lt.s32.totalorder %s40_s29, %s40_s29 }
  0x1a   :  { %p392_p10 = scmp.ne.s32.totalorder %s40_s29, %s391_s30  ;;  %p397_p12 = scmp.lt.s32.totalorder %s391_s30, %s391_s30 }
  0x1c   :  { %p398_p13 = por %p397_p12, %p396_p11 }
  0x1e   :  { %p399_p0 = pnand %p398_p13, %p392_p10 }
  0x20   :  { %402 = shalt.err (!%p399_p0)
}
  0x21   :  { %s454_s1 = smov 128   ;;  %s455_s6 = smov 8  }
  0x22   :  { %45 = dma.hbm_to_vmem [thread:$0]  %s532_s2, 512, %s40_s29, [#allocation6], %s454_s1, %s454_s1, %s455_s6  }
  0x23   :  { %s456_s9 = smov [#allocation8]  }
  0x24   :  { %s51_s10 = sshll.u32 %s456_s9, 4  ;;  %s52_s10 = int_to_ptr.vmem [resolvable:$true] %s51_s10 }
  0x25   :  { %s411_s0 = scalar_lea.vmem %s52_s10, 2048  ;;  %p416_p2 = scmp.lt.s32.totalorder %s52_s10, %s52_s10 }
  0x26   :  { %p412_p1 = scmp.ne.s32.totalorder %s52_s10, %s411_s0  ;;  %p417_p3 = scmp.lt.s32.totalorder %s411_s0, %s411_s0 }
  0x28   :  { %p418_p4 = por %p417_p3, %p416_p2 }
  0x2a   :  { %p419_p5 = pnand %p418_p4, %p412_p1 }
  0x2c   :  { %422 = shalt.err (!%p419_p5)
}
  0x2d   :  { %57 = dma.hbm_to_vmem [thread:$0]  %s533_s3, 2048, %s52_s10, [#allocation9], %s454_s1, %s454_s1, %s455_s6  }
  0x2e   :  { %443 = dma.done.wait [#allocation3], 128  }
  0x2f   :  { %444 = vsyncadd [#allocation3], 4294967168 }
  0x30   :  { %445 = dma.done.wait [#allocation6], 640  }
  0x31   :  { %446 = vsyncadd [#allocation6], 4294966656 }
  0x32   :  { %447 = dma.done.wait [#allocation9], 2048  }
  0x33   :  { %448 = vsyncadd [#allocation9], 4294965248  ;;  %v457_v0 = vmov 0.0   ;;  %vm458_vm0 = vmmov 0   ;;  %v93_v1 = vld [vmem:[#allocation8 + $0x78] sm:$0xff]  ;;  %v92_v2 = vld [vmem:[#allocation8 + $0x70] sm:$0xff] }
  0x34   :  { %288 = vmatprep.subr.mxu0 %v457_v0  ;;  %323 = vmatprep.subr.mxu1 %v457_v0  ;;  %v91_v3 = vld [vmem:[#allocation8 + $0x68] sm:$0xff]  ;;  %v90_v4 = vld [vmem:[#allocation8 + $0x60] sm:$0xff]  ;;  %v76_v5 = vld [vmem:[#allocation7 + $0x18] sm:$0xff]  ;;  %vm164_vm1 = vcmask 261120   ;;  %s459_s13 = smov [#allocation10]  }
  0x35   :  { %331 = vmatprep.mubr.msk.f32.mxu1 %vm458_vm0, %v457_v0  ;;  %320 = vmatprep.mubr.msk.f32.mxu0 %vm458_vm0, %v457_v0  ;;  %v75_v6 = vld [vmem:[#allocation7 + $0x10] sm:$0xff]  ;;  %v89_v7 = vld [vmem:[#allocation8 + $0x58] sm:$0xff]  ;;  %v74_v8 = vld [vmem:[#allocation7 + $0x8] sm:$0xff]  ;;  %s253_s14 = sshll.u32 %s459_s13, 4  ;;  %s254_s14 = int_to_ptr.vmem [resolvable:$true] %s253_s14 }
  0x36   :  { %289 = vmatpush3.msra.mxu0 %v93_v1  ;;  %324 = vmatpush3.msra.mxu1 %v76_v5  ;;  %v88_v9 = vld [vmem:[#allocation8 + $0x50] sm:$0xff]  ;;  %v73_v10 = vld [vmem:[#allocation7] sm:$0xff]  ;;  %v87_v12 = vld [vmem:[#allocation8 + $0x48] sm:$0xff]  ;;  %s423_s15 = scalar_lea.vmem %s254_s14, 128  ;;  %p428_p7 = scmp.lt.s32.totalorder %s254_s14, %s254_s14 }
  0x37   :  { %290 = vmatprep.subr.mxu0 %v457_v0  ;;  %325 = vmatprep.subr.mxu1 %v457_v0  ;;  %v72_v11 = vld [vmem:[#allocation2] sm:$0xff]  ;;  %v86_v13 = vld [vmem:[#allocation8 + $0x40] sm:$0xff]  ;;  %v85_v14 = vld [vmem:[#allocation8 + $0x38] sm:$0xff]  ;;  %p424_p6 = scmp.ne.s32.totalorder %s254_s14, %s423_s15  ;;  %p429_p8 = scmp.lt.s32.totalorder %s423_s15, %s423_s15 }
  0x38   :  { %291 = vmatpush3.msra.mxu0 %v92_v2  ;;  %326 = vmatpush3.msra.mxu1 %v75_v6  ;;  %v84_v15 = vld [vmem:[#allocation8 + $0x30] sm:$0xff]  ;;  %v83_v16 = vld [vmem:[#allocation8 + $0x28] sm:$0xff]  ;;  %v82_v17 = vld [vmem:[#allocation8 + $0x20] sm:$0xff] }
  0x39   :  { %292 = vmatprep.subr.mxu0 %v457_v0  ;;  %327 = vmatprep.subr.mxu1 %v457_v0  ;;  %v81_v18 = vld [vmem:[#allocation8 + $0x18] sm:$0xff]  ;;  %v80_v19 = vld [vmem:[#allocation8 + $0x10] sm:$0xff]  ;;  %v79_v20 = vld [vmem:[#allocation8 + $0x8] sm:$0xff]  ;;  %p430_p9 = por %p429_p8, %p428_p7 }
  0x3a   :  { %293 = vmatpush3.msra.mxu0 %v91_v3  ;;  %328 = vmatpush3.msra.mxu1 %v74_v8  ;;  %v78_v21 = vld [vmem:[#allocation8] sm:$0xff]  ;;  %v77_v22 = vld [vmem:[#allocation5] sm:$0xff]  ;;  %v265_v26 = vld [vmem:[%s534_s4] ss:$0 sm:$0xff] }
  0x3b   :  { %294 = vmatprep.subr.mxu0 %v457_v0  ;;  %329 = vmatprep.subr.mxu1 %v457_v0  ;;  %p431_p10 = pnand %p430_p9, %p424_p6 }
  0x3c   :  { %295 = vmatpush3.msra.mxu0 %v90_v4  ;;  %330 = vmatpush3.msra.mxu1 %v73_v10 }
  0x3d   :  { %296 = vmatprep.subr.mxu0 %v457_v0  ;;  %332 = vmatmul.mubr.msk.f32.vlgmr.msra.gmra.mxu1 %vm164_vm1, %v72_v11 }
  0x3e   :  { %297 = vmatpush3.msra.mxu0 %v89_v7 }
  0x3f   :  { %298 = vmatprep.subr.mxu0 %v457_v0 }
  0x40   :  { %299 = vmatpush3.msra.mxu0 %v88_v9 }
  0x41   :  { %300 = vmatprep.subr.mxu0 %v457_v0 }
  0x42   :  { %301 = vmatpush3.msra.mxu0 %v87_v12 }
  0x43   :  { %302 = vmatprep.subr.mxu0 %v457_v0 }
  0x44   :  { %303 = vmatpush3.msra.mxu0 %v86_v13 }
  0x45   :  { %304 = vmatprep.subr.mxu0 %v457_v0 }
  0x46   :  { %305 = vmatpush3.msra.mxu0 %v85_v14 }
  0x47   :  { %306 = vmatprep.subr.mxu0 %v457_v0 }
  0x48   :  { %307 = vmatpush3.msra.mxu0 %v84_v15 }
  0x49   :  { %308 = vmatprep.subr.mxu0 %v457_v0 }
  0x4a   :  { %309 = vmatpush3.msra.mxu0 %v83_v16 }
  0x4b   :  { %310 = vmatprep.subr.mxu0 %v457_v0 }
  0x4c   :  { %311 = vmatpush3.msra.mxu0 %v82_v17 }
  0x4d   :  { %312 = vmatprep.subr.mxu0 %v457_v0 }
  0x4e   :  { %313 = vmatpush3.msra.mxu0 %v81_v18 }
  0x4f   :  { %314 = vmatprep.subr.mxu0 %v457_v0 }
  0x50   :  { %315 = vmatpush3.msra.mxu0 %v80_v19 }
  0x51   :  { %316 = vmatprep.subr.mxu0 %v457_v0 }
  0x52   :  { %317 = vmatpush3.msra.mxu0 %v79_v20 }
  0x53   :  { %318 = vmatprep.subr.mxu0 %v457_v0 }
  0x54   :  { %319 = vmatpush3.msra.mxu0 %v78_v21 }
  0x55   :  { %321 = vmatmul.mubr.f32.vlgmr.msra.gmra.mxu0 %v77_v22 }
  0xfd   :  { %v234_v23 = vpop.f32.mrf.mxu1 }
  0xff   :  { %v333_v24 = vpop.f32.mrf.mxu1 }
 0x115   :  { %v160_v25 = vpop.f32.mrf.mxu0 }
 0x116   :  { %v235_v27 = vadd.f32 %v234_v23, %v160_v25 }
 0x117   :  { %v322_v28 = vpop.f32.mrf.mxu0 }
 0x118   :  { %v245_v29 = vadd.f32 %v265_v26, %v235_v27 }
 0x11a   :  { %246 = vst [vmem:[#allocation10] sm:$0xff] %v245_v29 }
 0x11b   :  { %434 = shalt.err (!%p431_p10)
}
 0x11c   :  { %256 = dma.vmem_to_hbm [thread:$0]  %s254_s14, 128, %s535_s5, [#allocation4]  }
 0x11d   :  { %449 = dma.done.wait [#allocation4], 128  }
 0x11e   :  { %450 = vsyncadd [#allocation4], 4294967168 }
 0x11f   :  { %260 = vsyncpa [#allocation3], 1 }
 0x120   :  { %261 = vsyncpa [#allocation6], 1 }
 0x121   :  { %262 = vsyncpa [#allocation9], 1 }
 0x122   :  { %263 = vsyncpa [#allocation4], 1 }

</bundles_post_ra>
